<compile_context>
chip_gen: v7x
topology: tpu7x:2x2x1
jax: 0.10.0
libtpu: 0.0.40
codegen_flags: <defaults>
</compile_context>

<pallas_src>
import functools

import jax
import jax.numpy as jnp
import numpy as np
from jax.experimental import pallas as pl
from jax.experimental.pallas import tpu as pltpu


# ----------------------------------------------------------------------------- kernel


def _fused_mha_kernel(x_ref, wqkv_ref, bqkv_ref, wo_ref, bo_ref, out_ref, *, num_heads: int):
    """Fused QKV projection + multi-head attention + output projection for one batch element.

    x_ref    : (1, S, D)  input dtype (cast to bf16 in-kernel for the MXU)
    wqkv_ref : (D, 3D)    bf16, [W_q.T * 1/sqrt(d_k) | W_k.T | W_v.T]  (in, out) layout
    bqkv_ref : (1, 3D)    f32,  [b_q * 1/sqrt(d_k)   | b_k   | b_v  ]
    wo_ref   : (D, D)     bf16, W_o.T (in, out) layout
    bo_ref   : (1, D)     f32
    out_ref  : (1, S, D)  output dtype
    """
    _, seq_len, d_model = x_ref.shape
    d_k = d_model // num_heads

    x = x_ref[0].astype(wqkv_ref.dtype)                                    # (S, D) bf16

    # Fused QKV projection: one wide-N MXU matmul with f32 accumulation.
    qkv = jnp.dot(x, wqkv_ref[...], preferred_element_type=jnp.float32) + bqkv_ref[...]
    qkv = qkv.astype(wqkv_ref.dtype)                                       # (S, 3D) bf16

    # In-kernel head split: lane slices of the lane-dense slab, stacked on a new major axis.
    def heads(offset):
        return jnp.stack(
            [qkv[:, offset + h * d_k: offset + (h + 1) * d_k] for h in range(num_heads)],
            axis=0)                                                        # (H, S, d_k)

    q = heads(0)                  # already scaled by 1/sqrt(d_k) (folded into the weights)
    k = heads(d_model)
    v = heads(2 * d_model)

    # Head-batched attention; softmax math in f32.
    scores = jnp.einsum("hqd,hkd->hqk", q, k,
                        preferred_element_type=jnp.float32)                # (H, S, S) f32
    m = jnp.max(scores, axis=-1, keepdims=True)
    e = jnp.exp(scores - m)
    denom = jnp.sum(e, axis=-1, keepdims=True)                             # (H, S, 1)

    # PV with unnormalized probabilities; normalization deferred to the (H, S, d_k) context
    # (S/d_k fewer VALU multiplies than scaling the (H,S,S) tensor); reciprocal -> EUP slot.
    ctx = jnp.einsum("hqk,hkd->hqd", e.astype(v.dtype), v,
                     preferred_element_type=jnp.float32)                   # (H, S, d_k) f32
    ctx = ctx * pl.reciprocal(denom, approx=True)
    # dropout == identity (eval mode)

    # Re-pack heads onto the lane axis -> (S, D), then a single K = D output projection.
    ctx_flat = jnp.concatenate([ctx[h] for h in range(num_heads)], axis=-1)  # (S, D) f32
    out = jnp.dot(ctx_flat.astype(wo_ref.dtype), wo_ref[...],
                  preferred_element_type=jnp.float32) + bo_ref[...]
    out_ref[0] = out.astype(out_ref.dtype)


# ----------------------------------------------------------------------------- VMEM budgeting


_DEFAULT_SCOPED_VMEM = 32 * 1024 * 1024  # default scoped limit on current chips


def _fused_vmem_bytes(seq_len: int, d_model: int, num_heads: int) -> int:
    """Rough per-grid-step VMEM footprint (blocks double-buffered + intermediates)."""
    d_k = d_model // num_heads
    blocks = (2 * seq_len * d_model * 4          # x block (f32, double buffered)
              + 2 * d_model * 3 * d_model * 2    # W_qkv (bf16)
              + 2 * 3 * d_model * 4              # b_qkv
              + 2 * d_model * d_model * 2        # W_o.T
              + 2 * d_model * 4                  # b_o
              + 2 * seq_len * d_model * 4)       # out block
    interm = (seq_len * 3 * d_model * 6                      # qkv f32 + bf16 copy
              + 3 * num_heads * seq_len * d_k * 2            # q/k/v heads
              + 3 * num_heads * seq_len * seq_len * 4        # scores + e (+ bf16 copy margin)
              + num_heads * seq_len * d_k * 4                # ctx
              + 2 * seq_len * d_model * 4)                   # ctx_flat / out acc
    return blocks + interm


def _vmem_limit_bytes(estimate: int):
    """Scoped-VMEM request clamped to the chip's physical VMEM (v7x has only 64 MiB)."""
    try:
        capacity = pltpu.get_tpu_info().vmem_capacity_bytes
    except Exception:  # query unavailable (e.g. interpret mode) -> assume v7x worst case
        capacity = 64 * 1024 * 1024
    ceiling = (capacity // 8) * 7        # leave headroom for the compiler's own scratch
    want = 2 * estimate + (2 << 20)
    if want <= _DEFAULT_SCOPED_VMEM:
        return None                      # default scoped limit already suffices
    return int(min(want, ceiling))


# ----------------------------------------------------------------------------- wrapper


def multi_head_attention(x, params, *, num_heads: int):
    """x: (B, S, D) float32.  params: W_q/W_k/W_v/W_o (D, D) in PyTorch layout, b_* (D,)."""
    B, S, D = x.shape
    assert D % num_heads == 0, "d_model must be divisible by num_heads"
    d_k = D // num_heads
    compute_dtype = jnp.bfloat16
    inv_scale = float(1.0 / np.sqrt(d_k))

    # --- one-time wrapper-side weight prep (plain XLA, amortized) ------------------------
    # PyTorch Linear is y = x @ W.T + b -> pre-transpose to (in, out).
    # Merge Q/K/V into a single (D, 3D) weight / (1, 3D) bias; fold 1/sqrt(d_k) into Q.
    wq_t = params["W_q"].T.astype(jnp.float32) * inv_scale
    wk_t = params["W_k"].T.astype(jnp.float32)
    wv_t = params["W_v"].T.astype(jnp.float32)
    w_qkv = jnp.concatenate([wq_t, wk_t, wv_t], axis=1).astype(compute_dtype)      # (D, 3D)
    b_qkv = jnp.concatenate(
        [params["b_q"].astype(jnp.float32) * inv_scale,
         params["b_k"].astype(jnp.float32),
         params["b_v"].astype(jnp.float32)]).reshape(1, 3 * D)                      # (1, 3D)
    wo_t = params["W_o"].T.astype(compute_dtype)                                    # (D, D)
    b_o = params["b_o"].reshape(1, D).astype(jnp.float32)                           # (1, D)

    limit = _vmem_limit_bytes(_fused_vmem_bytes(S, D, num_heads))
    kernel = functools.partial(_fused_mha_kernel, num_heads=num_heads)

    out = pl.pallas_call(
        kernel,
        out_shape=jax.ShapeDtypeStruct((B, S, D), x.dtype),
        grid_spec=pltpu.PrefetchScalarGridSpec(
            num_scalar_prefetch=0,
            grid=(B,),
            in_specs=[
                pl.BlockSpec((1, S, D), lambda b: (b, 0, 0)),          # x (per-batch block)
                pl.BlockSpec((D, 3 * D), lambda b: (0, 0)),            # W_qkv (resident)
                pl.BlockSpec((1, 3 * D), lambda b: (0, 0)),            # b_qkv (resident)
                pl.BlockSpec((D, D), lambda b: (0, 0)),                # W_o.T (resident)
                pl.BlockSpec((1, D), lambda b: (0, 0)),                # b_o   (resident)
            ],
            out_specs=pl.BlockSpec((1, S, D), lambda b: (b, 0, 0)),
        ),
        compiler_params=pltpu.CompilerParams(
            dimension_semantics=("parallel",),   # batch axis split across TCs on v7x
            vmem_limit_bytes=limit,
        ),
    )(x, w_qkv, b_qkv, wo_t, b_o)

    return out


# ----------------------------------------------------------------------------- reference


def mha_reference(x, params, *, num_heads: int):
    """Plain-JAX f32 reference mirroring the PyTorch forward (eval mode, no mask)."""
    B, S, D = x.shape
    d_k = D // num_heads
    scale = np.sqrt(d_k)

    def lin(t, w, b):
        return t @ w.T + b

    q = lin(x, params["W_q"], params["b_q"]).reshape(B, S, num_heads, d_k).transpose(0, 2, 1, 3)
    k = lin(x, params["W_k"], params["b_k"]).reshape(B, S, num_heads, d_k).transpose(0, 2, 1, 3)
    v = lin(x, params["W_v"], params["b_v"]).reshape(B, S, num_heads, d_k).transpose(0, 2, 1, 3)
    scores = jnp.einsum("bhqd,bhkd->bhqk", q, k) / scale
    attn = jax.nn.softmax(scores, axis=-1)
    ctx = jnp.einsum("bhqk,bhkd->bhqd", attn, v).transpose(0, 2, 1, 3).reshape(B, S, D)
    return lin(ctx, params["W_o"], params["b_o"])


# ----------------------------------------------------------------------------- main


if __name__ == "__main__":
    B, S, D = 2, 8, 32
    NUM_HEADS = 4

    key = jax.random.PRNGKey(0)
    keys = jax.random.split(key, 9)
    bound = 1.0 / np.sqrt(D)  # PyTorch nn.Linear default init range
    params = {
        "W_q": jax.random.uniform(keys[0], (D, D), jnp.float32, -bound, bound),
        "W_k": jax.random.uniform(keys[1], (D, D), jnp.float32, -bound, bound),
        "W_v": jax.random.uniform(keys[2], (D, D), jnp.float32, -bound, bound),
        "W_o": jax.random.uniform(keys[3], (D, D), jnp.float32, -bound, bound),
        "b_q": jax.random.uniform(keys[4], (D,), jnp.float32, -bound, bound),
        "b_k": jax.random.uniform(keys[5], (D,), jnp.float32, -bound, bound),
        "b_v": jax.random.uniform(keys[6], (D,), jnp.float32, -bound, bound),
        "b_o": jax.random.uniform(keys[7], (D,), jnp.float32, -bound, bound),
    }
    x = jax.random.normal(keys[8], (B, S, D), jnp.float32)

    out = multi_head_attention(x, params, num_heads=NUM_HEADS)
    out = jax.block_until_ready(out)

    ref = mha_reference(x, params, num_heads=NUM_HEADS)
    # Tolerance accounts for bf16 MXU inputs (f32 accumulation, f32 softmax, approx reciprocal).
    np.testing.assert_allclose(np.asarray(out), np.asarray(ref), rtol=3e-2, atol=3e-2)

    print("KERNEL_OK")
</pallas_src>

<mosaic_0001>
module attributes {stable_mosaic.version = 11 : i64} {
  func.func @_fused_mha_kernel(%arg0: i32, %arg1: memref<1x8x32xf32, #tpu.memory_space<vmem>>, %arg2: memref<32x96xbf16, #tpu.memory_space<vmem>>, %arg3: memref<1x96xf32, #tpu.memory_space<vmem>>, %arg4: memref<32x32xbf16, #tpu.memory_space<vmem>>, %arg5: memref<1x32xf32, #tpu.memory_space<vmem>>, %arg6: memref<1x8x32xf32, #tpu.memory_space<vmem>>) attributes {dimension_semantics = [#tpu.dimension_semantics<parallel>], iteration_bounds = array<i64: 2>, scalar_prefetch = 0 : i64, scratch_operands = 0 : i64, tpu.core_type = #tpu.core_type<tc>, window_params = [{transform_indices = @transform_0, window_bounds = array<i64: 1, 8, 32>}, {pipeline_mode = #tpu.pipeline_mode<synchronous>, transform_indices = @transform_1, window_bounds = array<i64: 32, 96>}, {pipeline_mode = #tpu.pipeline_mode<synchronous>, transform_indices = @transform_2, window_bounds = array<i64: 1, 96>}, {pipeline_mode = #tpu.pipeline_mode<synchronous>, transform_indices = @transform_3, window_bounds = array<i64: 32, 32>}, {pipeline_mode = #tpu.pipeline_mode<synchronous>, transform_indices = @transform_4, window_bounds = array<i64: 1, 32>}, {transform_indices = @transform_5, window_bounds = array<i64: 1, 8, 32>}]} {
    %c0 = arith.constant 0 : index
    %c0_0 = arith.constant 0 : index
    %c0_1 = arith.constant 0 : index
    %0 = vector.load %arg1[%c0, %c0_0, %c0_1] : memref<1x8x32xf32, #tpu.memory_space<vmem>>, vector<1x8x32xf32>
    %1 = vector.shape_cast %0 : vector<1x8x32xf32> to vector<8x32xf32>
    %2 = arith.truncf %1 : vector<8x32xf32> to vector<8x32xbf16>
    %c0_2 = arith.constant 0 : index
    %c0_3 = arith.constant 0 : index
    %3 = vector.load %arg2[%c0_2, %c0_3] : memref<32x96xbf16, #tpu.memory_space<vmem>>, vector<32x96xbf16>
    %cst = arith.constant dense<0.000000e+00> : vector<8x96xf32>
    %4 = tpu.matmul %2, %3, %cst {dimension_numbers = #tpu.dot_dimension_numbers<[1], [0], [0], [1], [0, 0, 1, 1], [], []>} : vector<8x32xbf16>, vector<32x96xbf16>, vector<8x96xf32> -> vector<8x96xf32>
    %c0_4 = arith.constant 0 : index
    %c0_5 = arith.constant 0 : index
    %5 = vector.load %arg3[%c0_4, %c0_5] : memref<1x96xf32, #tpu.memory_space<vmem>>, vector<1x96xf32>
    %6 = vector.broadcast %5 : vector<1x96xf32> to vector<8x96xf32>
    %7 = arith.addf %4, %6 : vector<8x96xf32>
    %8 = arith.truncf %7 : vector<8x96xf32> to vector<8x96xbf16>
    %9 = vector.extract_strided_slice %8 {offsets = [0, 0], sizes = [8, 8], strides = [1, 1]} : vector<8x96xbf16> to vector<8x8xbf16>
    %10 = vector.extract_strided_slice %8 {offsets = [0, 8], sizes = [8, 8], strides = [1, 1]} : vector<8x96xbf16> to vector<8x8xbf16>
    %11 = vector.extract_strided_slice %8 {offsets = [0, 16], sizes = [8, 8], strides = [1, 1]} : vector<8x96xbf16> to vector<8x8xbf16>
    %12 = vector.extract_strided_slice %8 {offsets = [0, 24], sizes = [8, 8], strides = [1, 1]} : vector<8x96xbf16> to vector<8x8xbf16>
    %13 = vector.shape_cast %9 : vector<8x8xbf16> to vector<1x8x8xbf16>
    %14 = vector.shape_cast %10 : vector<8x8xbf16> to vector<1x8x8xbf16>
    %15 = vector.shape_cast %11 : vector<8x8xbf16> to vector<1x8x8xbf16>
    %16 = vector.shape_cast %12 : vector<8x8xbf16> to vector<1x8x8xbf16>
    %17 = tpu.concatenate %13, %14, %15, %16 in 0 : vector<1x8x8xbf16>, vector<1x8x8xbf16>, vector<1x8x8xbf16>, vector<1x8x8xbf16> -> vector<4x8x8xbf16>
    %18 = vector.extract_strided_slice %8 {offsets = [0, 32], sizes = [8, 8], strides = [1, 1]} : vector<8x96xbf16> to vector<8x8xbf16>
    %19 = vector.extract_strided_slice %8 {offsets = [0, 40], sizes = [8, 8], strides = [1, 1]} : vector<8x96xbf16> to vector<8x8xbf16>
    %20 = vector.extract_strided_slice %8 {offsets = [0, 48], sizes = [8, 8], strides = [1, 1]} : vector<8x96xbf16> to vector<8x8xbf16>
    %21 = vector.extract_strided_slice %8 {offsets = [0, 56], sizes = [8, 8], strides = [1, 1]} : vector<8x96xbf16> to vector<8x8xbf16>
    %22 = vector.shape_cast %18 : vector<8x8xbf16> to vector<1x8x8xbf16>
    %23 = vector.shape_cast %19 : vector<8x8xbf16> to vector<1x8x8xbf16>
    %24 = vector.shape_cast %20 : vector<8x8xbf16> to vector<1x8x8xbf16>
    %25 = vector.shape_cast %21 : vector<8x8xbf16> to vector<1x8x8xbf16>
    %26 = tpu.concatenate %22, %23, %24, %25 in 0 : vector<1x8x8xbf16>, vector<1x8x8xbf16>, vector<1x8x8xbf16>, vector<1x8x8xbf16> -> vector<4x8x8xbf16>
    %27 = vector.extract_strided_slice %8 {offsets = [0, 64], sizes = [8, 8], strides = [1, 1]} : vector<8x96xbf16> to vector<8x8xbf16>
    %28 = vector.extract_strided_slice %8 {offsets = [0, 72], sizes = [8, 8], strides = [1, 1]} : vector<8x96xbf16> to vector<8x8xbf16>
    %29 = vector.extract_strided_slice %8 {offsets = [0, 80], sizes = [8, 8], strides = [1, 1]} : vector<8x96xbf16> to vector<8x8xbf16>
    %30 = vector.extract_strided_slice %8 {offsets = [0, 88], sizes = [8, 8], strides = [1, 1]} : vector<8x96xbf16> to vector<8x8xbf16>
    %31 = vector.shape_cast %27 : vector<8x8xbf16> to vector<1x8x8xbf16>
    %32 = vector.shape_cast %28 : vector<8x8xbf16> to vector<1x8x8xbf16>
    %33 = vector.shape_cast %29 : vector<8x8xbf16> to vector<1x8x8xbf16>
    %34 = vector.shape_cast %30 : vector<8x8xbf16> to vector<1x8x8xbf16>
    %35 = tpu.concatenate %31, %32, %33, %34 in 0 : vector<1x8x8xbf16>, vector<1x8x8xbf16>, vector<1x8x8xbf16>, vector<1x8x8xbf16> -> vector<4x8x8xbf16>
    "tpu.trace_start"() <{level = 10 : i32, message = "hqd,hkd->hqk"}> : () -> ()
    %cst_6 = arith.constant dense<0.000000e+00> : vector<4x8x8xf32>
    %36 = tpu.matmul %17, %26, %cst_6 {dimension_numbers = #tpu.dot_dimension_numbers<[2], [2], [1], [1], [0, 0, 0, 1, 1, 1], [0], [0]>} : vector<4x8x8xbf16>, vector<4x8x8xbf16>, vector<4x8x8xf32> -> vector<4x8x8xf32>
    "tpu.trace_stop"() : () -> ()
    %cst_7 = arith.constant dense<0xFF800000> : vector<4x8xf32>
    %37 = vector.multi_reduction <maximumf>, %36, %cst_7 [2] : vector<4x8x8xf32> to vector<4x8xf32>
    %38 = vector.shape_cast %37 : vector<4x8xf32> to vector<4x8x1xf32>
    %39 = vector.broadcast %38 : vector<4x8x1xf32> to vector<4x8x8xf32>
    %40 = arith.subf %36, %39 : vector<4x8x8xf32>
    %41 = math.exp %40 : vector<4x8x8xf32>
    %cst_8 = arith.constant dense<0.000000e+00> : vector<4x8xf32>
    %42 = vector.multi_reduction <add>, %41, %cst_8 [2] : vector<4x8x8xf32> to vector<4x8xf32>
    %43 = vector.shape_cast %42 : vector<4x8xf32> to vector<4x8x1xf32>
    %44 = arith.truncf %41 : vector<4x8x8xf32> to vector<4x8x8xbf16>
    "tpu.trace_start"() <{level = 10 : i32, message = "hqk,hkd->hqd"}> : () -> ()
    %cst_9 = arith.constant dense<0.000000e+00> : vector<4x8x8xf32>
    %45 = tpu.matmul %44, %35, %cst_9 {dimension_numbers = #tpu.dot_dimension_numbers<[2], [1], [1], [2], [0, 0, 0, 1, 1, 2], [0], [0]>} : vector<4x8x8xbf16>, vector<4x8x8xbf16>, vector<4x8x8xf32> -> vector<4x8x8xf32>
    "tpu.trace_stop"() : () -> ()
    %46 = tpu.reciprocal %43 {approx = true} : vector<4x8x1xf32> -> vector<4x8x1xf32>
    %47 = vector.broadcast %46 : vector<4x8x1xf32> to vector<4x8x8xf32>
    %48 = arith.mulf %45, %47 : vector<4x8x8xf32>
    %49 = vector.extract_strided_slice %48 {offsets = [0, 0, 0], sizes = [1, 8, 8], strides = [1, 1, 1]} : vector<4x8x8xf32> to vector<1x8x8xf32>
    %50 = vector.shape_cast %49 : vector<1x8x8xf32> to vector<8x8xf32>
    %51 = vector.extract_strided_slice %48 {offsets = [1, 0, 0], sizes = [1, 8, 8], strides = [1, 1, 1]} : vector<4x8x8xf32> to vector<1x8x8xf32>
    %52 = vector.shape_cast %51 : vector<1x8x8xf32> to vector<8x8xf32>
    %53 = vector.extract_strided_slice %48 {offsets = [2, 0, 0], sizes = [1, 8, 8], strides = [1, 1, 1]} : vector<4x8x8xf32> to vector<1x8x8xf32>
    %54 = vector.shape_cast %53 : vector<1x8x8xf32> to vector<8x8xf32>
    %55 = vector.extract_strided_slice %48 {offsets = [3, 0, 0], sizes = [1, 8, 8], strides = [1, 1, 1]} : vector<4x8x8xf32> to vector<1x8x8xf32>
    %56 = vector.shape_cast %55 : vector<1x8x8xf32> to vector<8x8xf32>
    %57 = tpu.concatenate %50, %52, %54, %56 in 1 : vector<8x8xf32>, vector<8x8xf32>, vector<8x8xf32>, vector<8x8xf32> -> vector<8x32xf32>
    %58 = arith.truncf %57 : vector<8x32xf32> to vector<8x32xbf16>
    %c0_10 = arith.constant 0 : index
    %c0_11 = arith.constant 0 : index
    %59 = vector.load %arg4[%c0_10, %c0_11] : memref<32x32xbf16, #tpu.memory_space<vmem>>, vector<32x32xbf16>
    %cst_12 = arith.constant dense<0.000000e+00> : vector<8x32xf32>
    %60 = tpu.matmul %58, %59, %cst_12 {dimension_numbers = #tpu.dot_dimension_numbers<[1], [0], [0], [1], [0, 0, 1, 1], [], []>} : vector<8x32xbf16>, vector<32x32xbf16>, vector<8x32xf32> -> vector<8x32xf32>
    %c0_13 = arith.constant 0 : index
    %c0_14 = arith.constant 0 : index
    %61 = vector.load %arg5[%c0_13, %c0_14] : memref<1x32xf32, #tpu.memory_space<vmem>>, vector<1x32xf32>
    %62 = vector.broadcast %61 : vector<1x32xf32> to vector<8x32xf32>
    %63 = arith.addf %60, %62 : vector<8x32xf32>
    %c0_15 = arith.constant 0 : index
    %c0_16 = arith.constant 0 : index
    %c0_17 = arith.constant 0 : index
    %64 = vector.load %arg6[%c0_15, %c0_16, %c0_17] : memref<1x8x32xf32, #tpu.memory_space<vmem>>, vector<1x8x32xf32>
    %65 = vector.shape_cast %64 : vector<1x8x32xf32> to vector<8x32xf32>
    %66 = vector.shape_cast %63 : vector<8x32xf32> to vector<1x8x32xf32>
    tpu.vector_store %arg6[%c0_15, %c0_16, %c0_17], %66 {strides = array<i32>} : memref<1x8x32xf32, #tpu.memory_space<vmem>>, vector<1x8x32xf32>,
    return
  }
  func.func @transform_0(%arg0: i32) -> (i32, i32, i32) {
    %c0_i32 = arith.constant 0 : i32
    %c0_i32_0 = arith.constant 0 : i32
    %c0_i32_1 = arith.constant 0 : i32
    return %arg0, %c0_i32, %c0_i32_0 : i32, i32, i32
  }
  func.func @transform_1(%arg0: i32) -> (i32, i32) {
    %c0_i32 = arith.constant 0 : i32
    %c0_i32_0 = arith.constant 0 : i32
    %c0_i32_1 = arith.constant 0 : i32
    return %c0_i32, %c0_i32_0 : i32, i32
  }
  func.func @transform_2(%arg0: i32) -> (i32, i32) {
    %c0_i32 = arith.constant 0 : i32
    %c0_i32_0 = arith.constant 0 : i32
    %c0_i32_1 = arith.constant 0 : i32
    return %c0_i32, %c0_i32_0 : i32, i32
  }
  func.func @transform_3(%arg0: i32) -> (i32, i32) {
    %c0_i32 = arith.constant 0 : i32
    %c0_i32_0 = arith.constant 0 : i32
    %c0_i32_1 = arith.constant 0 : i32
    return %c0_i32, %c0_i32_0 : i32, i32
  }
  func.func @transform_4(%arg0: i32) -> (i32, i32) {
    %c0_i32 = arith.constant 0 : i32
    %c0_i32_0 = arith.constant 0 : i32
    %c0_i32_1 = arith.constant 0 : i32
    return %c0_i32, %c0_i32_0 : i32, i32
  }
  func.func @transform_5(%arg0: i32) -> (i32, i32, i32) {
    %c0_i32 = arith.constant 0 : i32
    %c0_i32_0 = arith.constant 0 : i32
    %c0_i32_1 = arith.constant 0 : i32
    return %arg0, %c0_i32, %c0_i32_0 : i32, i32, i32
  }
}

</mosaic_0001>

<bundles_post_ra>
// kernel: tpu_custom_call.1
= control target key start
LH: loop header
LB: loop body
LE: loop exit
PB: predicated region body
PF: predicated region fallthrough
CT: control target
= control target key end

     0   :  { %10 = vsyncpa [#allocation3], 0  ;;  %s1698_s0 = inlined_call_operand.hbm [shape: f32[2,8,32], index: 0, kind: input, shape index: {}]   ;;  %s1699_s1 = inlined_call_operand.hbm [shape: bf16[32,96], index: 1, kind: input, shape index: {}]   ;;  %s1700_s2 = inlined_call_operand.vmem [shape: f32[1,96], index: 2, kind: input, shape index: {}]   ;;  %s1701_s3 = inlined_call_operand.hbm [shape: bf16[32,32], index: 3, kind: input, shape index: {}]   ;;  %s1702_s4 = inlined_call_operand.vmem [shape: f32[1,32], index: 4, kind: input, shape index: {}]   ;;  %s1703_s5 = inlined_call_operand.hbm [shape: f32[2,8,32], index: 5, kind: output, shape index: {}]  }
   0x1   :  { %12 = vsyncpa [#allocation3 + $0x1], 0 }
   0x2   :  { %13 = vsyncpa [#allocation6], 0 }
   0x3   :  { %14 = vsyncpa [#allocation4], 0 }
   0x4   :  { %16 = vsyncpa [#allocation4 + $0x1], 0  ;;  %s1390_s18 = smov 0   ;;  %s1392_s19 = smov 0  }
   0x5   :  { %s1394_s20 = smov 0   ;;  %s1396_s21 = smov 0  }
   0x6 LB: > { %s1411_s22 = sadd.s32 4294967295, %s1342_s21   ;;  %s969_s23 = sadd.s32 4294967294, %s1342_s21   ;;  %s1342_s21 = sphi %s1396_s21, %s1723_s21   ;;  %s1338_s20 = sphi %s1394_s20, %s1722_s20   ;;  %s1334_s19 = sphi %s1392_s19, %s1721_s19   ;;  %s1330_s18 = sphi %s1390_s18, %s1720_s18  }
   0x7   : > { %p42_p0 = scmp.ne.s32.totalorder %s1334_s19, %s1330_s18  ;;  %p1704_p1 = scmp.eq.s32.totalorder %s1411_s22, 0 }
   0x8   : > { %p156_p3 = scmp.eq.s32.totalorder %s969_s23, 1  ;;  %p970_p5 = scmp.ge.s32.totalorder %s1342_s21, 1 }
   0x9   : > { %p1420_p4 = por %p1704_p1, %p42_p0  ;;  %p163_p7 = scmp.lt.s32.totalorder %s1342_s21, 3 }
   0xa   : > { %p1425_p6 = por %p156_p3, %p42_p0  ;;  %s1344_s27 = smov [#allocation5]  }
   0xb   : > { %s1707_s24 = scalar_select %p1420_p4, 1, 0 }
   0xc   : > { %s1708_s25 = scalar_select %p1425_p6, 1, 0 }
   0xd   : > { %p1430_p8 = pnand %p970_p5, %p163_p7  ;;  %s175_s28 = sshll.u32 %s1344_s27, 4  ;;  %s1434_s28 = int_to_ptr.vmem [resolvable:$true] %s175_s28 }
   0xe   : > { %s1345_s30 = smov [#allocation7]   ;;  %s1186_s9 = scalar_lea.hbm %s1699_s1, 256 }
   0xf   : > { %p1099_p9 = pneg %p1430_p8  ;;  %s191_s6 = sshll.u32 %s1345_s30, 4  ;;  %s1445_s6 = int_to_ptr.vmem [resolvable:$true] %s191_s6 }
  0x10   : > { %p1187_p12 = scmp.ne.s32.totalorder %s1699_s1, %s1186_s9  ;;  %p1193_p5 = scmp.lt.u32.totalorder %s1186_s9, %s1699_s1 }
  0x11   : > { %p1441_p11 = pnand %p1099_p9, %p1704_p1 }
  0x13   : > { %p1188_p13 = pneg %p1441_p11 }
  0x15   : > { %p1189_p0 = pnand %p1188_p13, %p1187_p12 }
  0x17   : > { %p1190_p3 = pneg %p1189_p0 }
  0x19   : > { %p1195_p7 = pnand %p1193_p5, %p1190_p3 }
  0x1b   : > { %1198 = shalt.err (!%p1195_p7)
}
  0x1c   : > { %s1199_s14 = scalar_lea.vmem %s1434_s28, 256  ;;  %p1207_p2 = scmp.lt.s32.totalorder %s1434_s28, %s1434_s28 }
  0x1d   : > { %p1200_p9 = scmp.ne.s32.totalorder %s1434_s28, %s1199_s14  ;;  %p1208_p12 = scmp.lt.s32.totalorder %s1199_s14, %s1199_s14 }
  0x1f   : > { %p1202_p10 = pnand %p1200_p9, %p1188_p13  ;;  %p1209_p0 = por %p1208_p12, %p1207_p2 }
  0x21   : > { %p1203_p1 = pneg %p1202_p10 }
  0x23   : > { %p1210_p6 = pnand %p1209_p0, %p1203_p1 }
  0x25   : > { %1213 = shalt.err (!%p1210_p6)
}
  0x26   : > { %s1346_s15 = smov 64   ;;  %s1347_s16 = smov 4  }
  0x27   : > { %1102 = dma.hbm_to_vmem [thread:$0]  (!%p1441_p11), %s1699_s1, 256, %s1434_s28, [#allocation6], %s1346_s15, %s1346_s15, %s1347_s16  }
  0x28   : > { %s1214_s7 = scalar_lea.hbm %s1701_s3, 256 }
  0x29   : > { %p1215_p2 = scmp.ne.s32.totalorder %s1701_s3, %s1214_s7  ;;  %p1221_p10 = scmp.lt.u32.totalorder %s1214_s7, %s1701_s3 }
  0x2b   : > { %p1217_p1 = pnand %p1215_p2, %p1188_p13 }
  0x2d   : > { %p1218_p6 = pneg %p1217_p1 }
  0x2f   : > { %p1223_p3 = pnand %p1221_p10, %p1218_p6 }
  0x31   : > { %1226 = shalt.err (!%p1223_p3)
}
  0x32   : > { %s1227_s28 = scalar_lea.vmem %s1445_s6, 256  ;;  %p1235_p12 = scmp.lt.s32.totalorder %s1445_s6, %s1445_s6 }
  0x33   : > { %p1228_p5 = scmp.ne.s32.totalorder %s1445_s6, %s1227_s28  ;;  %p1236_p0 = scmp.lt.s32.totalorder %s1227_s28, %s1227_s28 }
  0x35   : > { %p1230_p7 = pnand %p1228_p5, %p1188_p13  ;;  %p1237_p2 = por %p1236_p0, %p1235_p12 }
  0x37   : > { %p1231_p9 = pneg %p1230_p7 }
  0x39   : > { %p1238_p1 = pnand %p1237_p2, %p1231_p9 }
  0x3b   : > { %1241 = shalt.err (!%p1238_p1)
}
  0x3c   : > { %1105 = dma.hbm_to_vmem [thread:$0]  (!%p1441_p11), %s1701_s3, 256, %s1445_s6, [#allocation6], %s1346_s15, %s1346_s15, %s1347_s16  }
  0x3d   : > { %s1500_s14 = sadd.s32 1, %s1342_s21   ;;  %s29_s29 = sadd.s32 1, %s1338_s20 }
  0x3e   : > { %s26_s17 = ssub.s32 %s1342_s21, %s1500_s14  ;;  %p36_p13 = scmp.ne.s32.totalorder %s1338_s20, %s1334_s19 }
  0x3f   : > { %p27_p6 = scmp.eq.s32.totalorder %s26_s17, 0  ;;  %p37_p10 = scmp.eq.s32.totalorder %s1342_s21, 0 }
  0x40   : > { %p1711_p3 = scmp.eq.s32.totalorder %s1411_s22, 1  ;;  %p1116_p7 = scmp.lt.s32.totalorder %s1342_s21, 2 }
  0x41   : > { %s1516_s27 = scalar_select %p27_p6, %s1338_s20, %s29_s29  }
  0x42   : > { %p1510_p5 = por %p1711_p3, %p36_p13  ;;  %p38_p9 = por %p37_p10, %p36_p13 }
  0x43   : > { %s208_s30 = sand.u32 1, %s1338_s20   ;;  %s975_s6 = sshll.u32 %s1342_s21, 7 }
  0x44   : > { %s1712_s23 = scalar_select %p1510_p5, 1, 0 }
  0x45   : > { %s974_s7 = sshll.u32 %s208_s30, 3  ;;  %s1523_s8 = scalar_lea.hbm %s1698_s0, %s975_s6 }
  0x46   : > { %s212_s9 = scalar_lea.vmem [#allocation2], %s974_s7  ;;  %p1527_p11 = pnand %p1116_p7, %p38_p9 }
  0x47   : > { %s219_s10 = sshll.u32 %s212_s9, 4  ;;  %s209_s28 = scalar_lea.sflag [#allocation3], %s208_s30  ;;  %s1525_s10 = int_to_ptr.vmem [resolvable:$true] %s219_s10 }
  0x48   : > { %s1242_s12 = scalar_lea.hbm %s1523_s8, 128  ;;  %p1244_p0 = pneg %p1527_p11 }
  0x49   : > { %p1243_p12 = scmp.ne.s32.totalorder %s1523_s8, %s1242_s12  ;;  %s1247_s17 = scalar_lea.hbm %s1698_s0, 256 }
  0x4a   : > { %p1248_p13 = scmp.lt.u32.totalorder %s1523_s8, %s1698_s0  ;;  %p1249_p6 = scmp.lt.u32.totalorder %s1247_s17, %s1242_s12 }
  0x4b   : > { %p1245_p2 = pnand %p1244_p0, %p1243_p12  ;;  %p1251_p3 = scmp.lt.u32.totalorder %s1242_s12, %s1523_s8 }
  0x4c   : > { %p1250_p10 = por %p1249_p6, %p1248_p13 }
  0x4d   : > { %p1246_p1 = pneg %p1245_p2 }
  0x4e   : > { %p1252_p7 = por %p1251_p3, %p1250_p10 }
  0x50   : > { %p1253_p9 = pnand %p1252_p7, %p1246_p1 }
  0x52   : > { %1256 = shalt.err (!%p1253_p9)
}
  0x53   : > { %s1257_s30 = scalar_lea.vmem %s1525_s10, 128  ;;  %s1348_s15 = smov [#allocation2]  }
  0x54   : > { %p1258_p12 = scmp.ne.s32.totalorder %s1525_s10, %s1257_s30  ;;  %s1262_s16 = sshll.u32 %s1348_s15, 4  ;;  %s1263_s16 = int_to_ptr.vmem [resolvable:$false] %s1262_s16 }
  0x55   : > { %s1264_s9 = scalar_lea.vmem %s1263_s16, 256  ;;  %p1265_p4 = scmp.lt.s32.totalorder %s1525_s10, %s1263_s16 }
  0x56   : > { %p1260_p2 = pnand %p1258_p12, %p1244_p0  ;;  %p1266_p13 = scmp.lt.s32.totalorder %s1264_s9, %s1257_s30 }
  0x58   : > { %p1261_p5 = pneg %p1260_p2  ;;  %p1267_p6 = por %p1266_p13, %p1265_p4 }
  0x5a   : > { %p1268_p10 = pnand %p1267_p6, %p1261_p5 }
  0x5c   : > { %1271 = shalt.err (!%p1268_p10)
}
  0x5d   : > { %1109 = dma.hbm_to_vmem [thread:$0]  (!%p1527_p11), %s1523_s8, 128, %s1525_s10, %s209_s28  }
  0x5e   : > { %228 = sbr.rel (%p1430_p8) target bundleno = 1509 (0x5e5), region = 40  ;;  %s1559_s12 = sand.u32 (!%p1430_p8), 1, %s1334_s19  }
  0x5f   : > { %s977_s13 = sshll.u32 (!%p1430_p8), %s1559_s12, 3  ;;  %s231_s29 = scalar_lea.sflag (!%p1430_p8), [#allocation3], %s1559_s12 }
  0x60   : > { %s234_s17 = scalar_lea.vmem (!%p1430_p8), [#allocation2], %s977_s13  ;;  %p1714_p4 = scmp.ne.s32.totalorder (!%p1430_p8), %s1707_s24, 0 }
  0x65   : > { %1317 = dma.done.wait (%p1714_p4), %s231_s29, 128  }
  0x66   : > { %1319 = vsyncadd (%p1714_p4), %s231_s29, 4294967168  ;;  %p1715_p5 = scmp.eq.s32.totalorder %s1411_s22, 0 }
  0x68   : > { %1321 = dma.done.wait (%p1715_p5), [#allocation6], 512   ;;  %p1716_p8 = pmov %p1715_p5 }
  0x69   : > { %v1349_v0 = vmov 0.0   ;;  %vm1350_vm0 = vmmov 0   ;;  %v1166_v1 = vld [vmem:[#allocation5] sm:$0xff]   ;;  %v1167_v2 = vld [vmem:[#allocation5 + $0x8] sm:$0xff]   ;;  %v270_v3 = vld [vmem:[%s234_s17] sm:$0xff]  ;;  %vm295_vm1 = vcmask 261120  }
  0x6a   : > { %1323 = vsyncadd (%p1716_p8), [#allocation6], 4294966784  ;;  %1023 = vmatprep.subr.bf16.mxu0 %v1349_v0  ;;  %1027 = vmatprep.mubr.msk.bf16.mxu0 %vm1350_vm0, %v1349_v0  ;;  %v271_v4 = vpack.c.bf16 %v270_v3, %v270_v3  ;;  %v981_v5 = vld [vmem:[%s1700_s2] ss:$0 sm:$0xff]  ;;  %s1351_s8 = smov 104   ;;  %s1352_s10 = smov 120  }
  0x6b   : > { %1031 = vmatprep.subr.bf16.mxu1 %v1349_v0  ;;  %1033 = vmatprep.mubr.msk.bf16.mxu1 %vm1350_vm0, %v1349_v0  ;;  %s1353_s11 = smov 96   ;;  %s1354_s28 = smov 112   ;;  %vm349_vm2 = vcmask 64512   ;;  %vm585_vm3 = vcmask 1043456   ;;  %vm794_vm4 = vcmask 130048   ;;  %vm796_vm5 = vcmask 195584  }
  0x6c   : > { %1024 = vmatpush3.bf16.msra.mxu0 %v1166_v1  ;;  %s1355_s7 = smov 64   ;;  %s1356_s6 = smov 8  }
  0x6d   : > { %1025 = vmatprep.subr.bf16.mxu0 %v1349_v0  ;;  %s1357_s30 = smov 16   ;;  %s1358_s15 = smov 24  }
  0x6e   : > { %s998_s29 = sshll.u32 %s1411_s22, 7  ;;  %s268_s17 = scalar_lea.vmem [#allocation8], %s977_s13 }
  0x6f   : > { %s880_s24 = sshll.u32 %s268_s17, 4  ;;  %s867_s22 = scalar_lea.sflag [#allocation4], %s1559_s12  ;;  %s1655_s24 = int_to_ptr.vmem [resolvable:$true] %s880_s24 }
  0x70   : > { %1026 = vmatpush3.bf16.msra.mxu0 %v1167_v2  ;;  %s1272_s13 = scalar_lea.vmem %s1655_s24, 128  ;;  %p1717_p0 = scmp.ne.s32.totalorder %s1712_s23, 0 }
  0x71   : > { %1037 = vmatprep.subr.bf16.mxu0 %v1349_v0  ;;  %p1273_p11 = scmp.ne.s32.totalorder %s1655_s24, %s1272_s13 }
  0x73   : > { %1028 = vmatmul.mubr.msk.bf16.vlgmr.msra.gmra.mrb[0].mxu0 %vm295_vm1, %v271_v4  ;;  %p1274_p1 = pnand %p1273_p11, %p1717_p0 }
  0x74   : > { %1039 = vmatprep.mubr.msk.bf16.mxu0 %vm1350_vm0, %v1349_v0 }
  0x75   : > { %p1275_p3 = pneg %p1274_p1 }
 0x146   : > { %v333_v6 = vpop.f32.mrb[0].mxu0 }
 0x147   : > { %v334_v7 = vadd.f32 %v981_v5, %v333_v6  ;;  %v1029_v8 = vpop.f32.mrb[1].mxu0 }
 0x148   : > { %v336_v9 = vpop.f32.mrb[2].mxu0 }
 0x149   : > { %v339_v10 = vpack.c.bf16 %v334_v7, %v334_v7  ;;  %v1030_v11 = vpop.f32.mrb[3].mxu0 }
 0x14b   : > { %345 = vrot.lane.b32.xlu1 %v339_v10, %s1351_s8  ;;  %341 = vrot.lane.b32.xlu0 %v339_v10, %s1352_s10  ;;  %s1653_s10 = scalar_lea.hbm %s1703_s5, %s998_s29 }
 0x14f   : > { %347 = vrot.lane.b32.xlu1 %v339_v10, %s1353_s11  ;;  %343 = vrot.lane.b32.xlu0 %v339_v10, %s1354_s28 }
 0x1bd   : > { %v1587_v12 = vpop.permute.xlu1 %345  ;;  %v342_v13 = vpop.permute.xlu0 %341 }
 0x1be   : > { %396 = vrot.lane.b32.xlu0 %v342_v13, %s1353_s11 }
 0x1c1   : > { %v348_v14 = vpop.permute.xlu1 %347  ;;  %v344_v15 = vpop.permute.xlu0 %343 }
 0x1c2   : > { %492 = vrot.lane.b32.xlu0 %v1587_v12, %s1353_s11  ;;  %444 = vrot.lane.b32.xlu1 %v344_v15, %s1353_s11  ;;  %v354_v16 = vsel %vm349_vm2, %v348_v14, 0  ;;  %s1359_s11 = smov [#allocation8]  }
 0x1c3   : > { %1032 = vmatpush3.bf16.xpose.msra.mxu1 %v354_v16  ;;  %s1276_s28 = sshll.u32 %s1359_s11, 4  ;;  %s1277_s28 = int_to_ptr.vmem [resolvable:$false] %s1276_s28 }
 0x1c4   : > { %1043 = vmatprep.subr.bf16.mxu1 %v1349_v0  ;;  %p1279_p7 = scmp.lt.s32.totalorder %s1655_s24, %s1277_s28 }
 0x1c6   : > { %580 = vrot.lane.b32.xlu0 %v339_v10, %s1355_s7  ;;  %629 = vrot.lane.b32.xlu1 %v342_v13, %s1355_s7 }
 0x1ca   : > { %1034 = vmatmul.mubr.msk.bf16.vlgmr.msra.gmra.mrb[0].mxu1 %vm349_vm2, %v339_v10 }
 0x1cb   : > { %1045 = vmatprep.mubr.msk.bf16.mxu1 %vm1350_vm0, %v1349_v0 }
 0x230   : > { %v397_v17 = vpop.permute.xlu0 %396 }
 0x231   : > { %v402_v18 = vsel %vm349_vm2, %v397_v17, 0 }
 0x232   : > { %1038 = vmatpush3.bf16.xpose.msra.mxu0 %v402_v18  ;;  %v1168_v18 = vld [vmem:[#allocation7] sm:$0xff]  }
 0x233   : > { %1049 = vmatprep.subr.bf16.mxu0 %v1349_v0 }
 0x234   : > { %v445_v19 = vpop.permute.xlu1 %444  ;;  %v493_v20 = vpop.permute.xlu0 %492 }
 0x235   : > { %v450_v21 = vsel %vm349_vm2, %v445_v19, 0  ;;  %v498_v22 = vsel %vm349_vm2, %v493_v20, 0  ;;  %v1169_v20 = vld [vmem:[#allocation7 + $0x8] sm:$0xff]  }
 0x236   : > { %1044 = vmatpush3.bf16.xpose.msra.mxu1 %v450_v21 }
 0x237   : > { %1055 = vmatprep.subr.bf16.mxu1 %v1349_v0 }
 0x238   : > { %v581_v23 = vpop.permute.xlu0 %580  ;;  %v630_v25 = vpop.permute.xlu1 %629 }
 0x239   : > { %1040 = vmatmul.mubr.msk.bf16.vlgmr.msra.gmra.mrb[4].mxu0 %vm349_vm2, %v342_v13  ;;  %v587_v24 = vsel %vm585_vm3, %v581_v23, 0  ;;  %v635_v26 = vsel %vm585_vm3, %v630_v25, 0 }
 0x23a   : > { %1050 = vmatpush3.bf16.xpose.msra.mxu0 %v498_v22  ;;  %1051 = vmatprep.mubr.msk.bf16.mxu0 %vm1350_vm0, %v1349_v0 }
 0x23b   : > { %1061 = vmatprep.subr.bf16.mxu0 %v1349_v0 }
 0x23d   : > { %1046 = vmatmul.mubr.msk.bf16.vlgmr.msra.gmra.mrb[4].mxu1 %vm349_vm2, %v344_v15 }
 0x23e   : > { %1056 = vmatpush3.bf16.msra.mxu1 %v587_v24  ;;  %1057 = vmatprep.mubr.msk.bf16.mxu1 %vm1350_vm0, %v1349_v0 }
 0x23f   : > { %1067 = vmatprep.subr.bf16.mxu1 %v1349_v0 }
 0x241   : > { %1052 = vmatmul.mubr.msk.bf16.vlgmr.msra.gmra.mrb[8].mxu0 %vm349_vm2, %v1587_v12 }
 0x242   : > { %1062 = vmatpush3.bf16.msra.mxu0 %v635_v26  ;;  %1063 = vmatprep.mubr.msk.bf16.mxu0 %vm1350_vm0, %v1349_v0 }
 0x243   : > { %1073 = vmatprep.subr.bf16.mxu0 %v1349_v0 }
 0x29d   : > { %v390_v27 = vpop.f32.mrb[0].mxu1 }
 0x29e   : > { %v1035_v28 = vpop.f32.mrb[1].mxu1  ;;  %v540_v29 = vsel %vm349_vm2, %v390_v27, -inf }
 0x29f   : > { %v393_v30 = vpop.f32.mrb[2].mxu1  ;;  %541 = vmax.xlane.f32.xlu1 %v540_v29 }
 0x2a0   : > { %v1036_v31 = vpop.f32.mrb[3].mxu1 }
 0x30c   : > { %v438_v32 = vpop.f32.mrb[4].mxu0 }
 0x30d   : > { %v1041_v33 = vpop.f32.mrb[5].mxu0  ;;  %v543_v34 = vsel %vm349_vm2, %v438_v32, -inf }
 0x30e   : > { %544 = vmax.xlane.f32.xlu0 %v543_v34  ;;  %v441_v35 = vpop.f32.mrb[6].mxu0 }
 0x30f   : > { %v1042_v36 = vpop.f32.mrb[7].mxu0 }
 0x310   : > { %v486_v37 = vpop.f32.mrb[4].mxu1 }
 0x311   : > { %v1047_v38 = vpop.f32.mrb[5].mxu1  ;;  %v546_v39 = vsel %vm349_vm2, %v486_v37, -inf }
 0x312   : > { %v489_v40 = vpop.f32.mrb[6].mxu1  ;;  %547 = vmax.xlane.f32.xlu0 %v546_v39 }
 0x313   : > { %v1048_v41 = vpop.f32.mrb[7].mxu1 }
 0x314   : > { %v534_v42 = vpop.f32.mrb[8].mxu0 }
 0x315   : > { %v1053_v43 = vpop.f32.mrb[9].mxu0  ;;  %v549_v44 = vsel %vm349_vm2, %v534_v42, -inf }
 0x316   : > { %550 = vmax.xlane.f32.xlu1 %v549_v44  ;;  %v537_v45 = vpop.f32.mrb[10].mxu0 }
 0x317   : > { %v1054_v46 = vpop.f32.mrb[11].mxu0 }
 0x327   : > { %677 = vrot.lane.b32.xlu1 %v344_v15, %s1355_s7 }
 0x328   : > { %725 = vrot.lane.b32.xlu0 %v1587_v12, %s1355_s7  ;;  %s1278_s7 = scalar_lea.vmem %s1277_s28, 256 }
 0x329   : > { %p1280_p9 = scmp.lt.s32.totalorder %s1278_s7, %s1272_s13 }
 0x32b   : > { %p1281_p12 = por %p1280_p9, %p1279_p7 }
 0x32c   : > { %v542_v47 = vpop.xlane.xlu1 %541 }
 0x32d   : > { %v552_v48 = vsub.f32 %v390_v27, %v542_v47  ;;  %p1282_p2 = pnand %p1281_p12, %p1275_p3 }
 0x32f   : > { %v556_v49 = vmul.f32 1.442695, %v552_v48  ;;  %v993_v48 = vld [vmem:[%s1702_s4] ss:$0 sm:$0xff] }
 0x331   : > { %1170 = vpow2.f32 %v556_v49 }
 0x33b   : > { %v1171_v50 = vpop.eup %1170 }
 0x33c   : > { %v576_v51 = vpack.c.bf16 %v1171_v50, %v1171_v50  ;;  %v564_v7 = vsel %vm349_vm2, %v1171_v50, 0.0 }
 0x33e   : > { %1058 = vmatmul.mubr.msk.bf16.vlgmr.msra.gmra.mrb[8].mxu1 %vm349_vm2, %v576_v51 }
 0x33f   : > { %1069 = vmatprep.mubr.msk.bf16.mxu1 %vm1350_vm0, %v1349_v0 }
 0x39b   : > { %v545_v52 = vpop.xlane.xlu0 %544 }
 0x39c   : > { %v553_v53 = vsub.f32 %v438_v32, %v545_v52 }
 0x39e   : > { %v558_v54 = vmul.f32 1.442695, %v553_v53 }
 0x39f   : > { %v548_v55 = vpop.xlane.xlu0 %547 }
 0x3a0   : > { %1172 = vpow2.f32 %v558_v54  ;;  %v554_v56 = vsub.f32 %v486_v37, %v548_v55 }
 0x3a2   : > { %v560_v57 = vmul.f32 1.442695, %v554_v56 }
 0x3a3   : > { %v551_v58 = vpop.xlane.xlu1 %550  ;;  %v726_v1 = vpop.permute.xlu0 %725 }
 0x3a4   : > { %1174 = vpow2.f32 %v560_v57  ;;  %v555_v59 = vsub.f32 %v534_v42, %v551_v58  ;;  %v731_v4 = vsel %vm585_vm3, %v726_v1, 0 }
 0x3a6   : > { %v562_v60 = vmul.f32 1.442695, %v555_v59 }
 0x3a7   : > { %v678_v61 = vpop.permute.xlu1 %677 }
 0x3a8   : > { %1176 = vpow2.f32 %v562_v60  ;;  %v683_v62 = vsel %vm585_vm3, %v678_v61, 0 }
 0x3a9   : > { %1068 = vmatpush3.bf16.msra.mxu1 %v683_v62 }
 0x3aa   : > { %v1173_v63 = vpop.eup %1172  ;;  %1079 = vmatprep.subr.bf16.mxu1 %v1349_v0 }
 0x3ab   : > { %v567_v2 = vsel %vm349_vm2, %v1173_v63, 0.0  ;;  %v577_v3 = vpack.c.bf16 %v1173_v63, %v1173_v63 }
 0x3ac   : > { %568 = vadd.xlane.f32.xlu1 %v567_v2 }
 0x3ad   : > { %1064 = vmatmul.mubr.msk.bf16.vlgmr.msra.gmra.mrb[12].mxu0 %vm349_vm2, %v577_v3 }
 0x3ae   : > { %v1175_v5 = vpop.eup %1174  ;;  %1074 = vmatpush3.bf16.msra.mxu0 %v731_v4  ;;  %1075 = vmatprep.mubr.msk.bf16.mxu0 %vm1350_vm0, %v1349_v0 }
 0x3af   : > { %v570_v6 = vsel %vm349_vm2, %v1175_v5, 0.0  ;;  %v578_v8 = vpack.c.bf16 %v1175_v5, %v1175_v5 }
 0x3b0   : > { %571 = vadd.xlane.f32.xlu0 %v570_v6  ;;  %565 = vadd.xlane.f32.xlu1 %v564_v7 }
 0x3b1   : > { %1070 = vmatmul.mubr.msk.bf16.vlgmr.msra.gmra.mrb[12].mxu1 %vm349_vm2, %v578_v8 }
 0x3b2   : > { %v1177_v9 = vpop.eup %1176  ;;  %1083 = vmatprep.mubr.msk.bf16.mxu1 %vm1350_vm0, %v1349_v0  ;;  %1080 = vmatpush3.bf16.msra.mxu1 %v1168_v18 }
 0x3b3   : > { %v573_v10 = vsel %vm349_vm2, %v1177_v9, 0.0  ;;  %v579_v11 = vpack.c.bf16 %v1177_v9, %v1177_v9  ;;  %1081 = vmatprep.subr.bf16.mxu1 %v1349_v0 }
 0x3b4   : > { %574 = vadd.xlane.f32.xlu0 %v573_v10 }
 0x3b5   : > { %1076 = vmatmul.mubr.msk.bf16.vlgmr.msra.gmra.mrb[16].mxu0 %vm349_vm2, %v579_v11 }
 0x3b6   : > { %1082 = vmatpush3.bf16.msra.mxu1 %v1169_v20 }
 0x411   : > { %v623_v12 = vpop.f32.mrb[8].mxu1 }
 0x412   : > { %v1059_v13 = vpop.f32.mrb[9].mxu1 }
 0x413   : > { %v626_v14 = vpop.f32.mrb[10].mxu1 }
 0x414   : > { %v1060_v15 = vpop.f32.mrb[11].mxu1 }
 0x439   : > { %v569_v16 = vpop.xlane.xlu1 %568 }
 0x43a   : > { %1178 = vrcp.f32 %v569_v16 }
 0x43d   : > { %v572_v17 = vpop.xlane.xlu0 %571  ;;  %v566_v38 = vpop.xlane.xlu1 %565 }
 0x43e   : > { %1180 = vrcp.f32 %v572_v17 }
 0x441   : > { %v575_v19 = vpop.xlane.xlu0 %574 }
 0x442   : > { %1182 = vrcp.f32 %v575_v19 }
 0x443   : > { %1184 = vrcp.f32 %v566_v38 }
 0x444   : > { %v1179_v21 = vpop.eup %1178 }
 0x448   : > { %v1181_v27 = vpop.eup %1180 }
 0x44c   : > { %v1183_v0 = vpop.eup %1182 }
 0x44d   : > { %v1185_v39 = vpop.eup %1184 }
 0x44e   : > { %v777_v42 = vmul.f32 %v1185_v39, %v623_v12 }
 0x480   : > { %v671_v22 = vpop.f32.mrb[12].mxu0 }
 0x481   : > { %v778_v23 = vmul.f32 %v1179_v21, %v671_v22  ;;  %v1065_v24 = vpop.f32.mrb[13].mxu0 }
 0x482   : > { %v674_v25 = vpop.f32.mrb[14].mxu0 }
 0x483   : > { %782 = vrot.lane.b32.xlu0 %v778_v23, %s1356_s6  ;;  %v1066_v26 = vpop.f32.mrb[15].mxu0 }
 0x484   : > { %v719_v28 = vpop.f32.mrb[12].mxu1 }
 0x485   : > { %v779_v29 = vmul.f32 %v1181_v27, %v719_v28  ;;  %v1071_v30 = vpop.f32.mrb[13].mxu1 }
 0x486   : > { %v722_v31 = vpop.f32.mrb[14].mxu1 }
 0x487   : > { %786 = vrot.lane.b32.xlu1 %v779_v29, %s1357_s30  ;;  %v1072_v32 = vpop.f32.mrb[15].mxu1 }
 0x488   : > { %v767_v33 = vpop.f32.mrb[16].mxu0 }
 0x489   : > { %v780_v34 = vmul.f32 %v1183_v0, %v767_v33  ;;  %v1077_v35 = vpop.f32.mrb[17].mxu0 }
 0x48a   : > { %v770_v36 = vpop.f32.mrb[18].mxu0 }
 0x48b   : > { %790 = vrot.lane.b32.xlu1 %v780_v34, %s1358_s15  ;;  %v1078_v37 = vpop.f32.mrb[19].mxu0 }
 0x4f5   : > { %v783_v40 = vpop.permute.xlu0 %782 }
 0x4f6   : > { %v793_v43 = vsel %vm349_vm2, %v777_v42, %v783_v40 }
 0x4f9   : > { %v787_v41 = vpop.permute.xlu1 %786 }
 0x4fa   : > { %v795_v44 = vsel %vm794_vm4, %v793_v43, %v787_v41 }
 0x4fd   : > { %v791_v45 = vpop.permute.xlu1 %790 }
 0x4fe   : > { %v797_v46 = vsel %vm796_vm5, %v795_v44, %v791_v45 }
 0x4ff   : > { %v798_v47 = vpack.c.bf16 %v797_v46, %v797_v46 }
 0x501   : > { %1084 = vmatmul.mubr.msk.bf16.vlgmr.msra.gmra.mrb[16].mxu1 %vm295_vm1, %v798_v47 }
 0x5d4   : > { %v859_v49 = vpop.f32.mrb[16].mxu1 }
 0x5d5   : > { %v860_v50 = vadd.f32 %v993_v48, %v859_v49  ;;  %v1085_v51 = vpop.f32.mrb[17].mxu1 }
 0x5d6   : > { %v862_v52 = vpop.f32.mrb[18].mxu1 }
 0x5d7   : > { %v1086_v53 = vpop.f32.mrb[19].mxu1  ;;  %865 = vst.msk [vmem:[%s268_s17] sm:$0xff] %vm295_vm1, %v860_v50 }
 0x5d8   : > { %1285 = shalt.err (!%p1282_p2)
}
 0x5d9   : > { %s1286_s12 = scalar_lea.hbm %s1653_s10, 128  ;;  %s1290_s15 = scalar_lea.hbm %s1703_s5, 256 }
 0x5da   : > { %p1287_p13 = scmp.ne.s32.totalorder %s1653_s10, %s1286_s12  ;;  %p1291_p4 = scmp.lt.u32.totalorder %s1653_s10, %s1703_s5 }
 0x5db   : > { %p1292_p5 = scmp.lt.u32.totalorder %s1290_s15, %s1286_s12  ;;  %p1294_p11 = scmp.lt.u32.totalorder %s1286_s12, %s1653_s10 }
 0x5dc   : > { %p1288_p6 = pnand %p1287_p13, %p1717_p0 }
 0x5dd   : > { %p1293_p8 = por %p1292_p5, %p1291_p4 }
 0x5de   : > { %p1289_p10 = pneg %p1288_p6 }
 0x5df   : > { %p1295_p1 = por %p1294_p11, %p1293_p8 }
 0x5e1   : > { %p1296_p3 = pnand %p1295_p1, %p1289_p10 }
 0x5e3   : > { %1299 = shalt.err (!%p1296_p3)
}
 0x5e4   : > { %1097 = dma.vmem_to_hbm [thread:$0]  (%p1717_p0), %s1655_s24, 128, %s1653_s10, %s867_s22  }
 0x5e5 PF: > { %s892_s29 = sand.u32 1, %s1330_s18   ;;  %p1718_p7 = scmp.ne.s32.totalorder %s1708_s25, 0 }
 0x5e6   : > { %p1719_p9 = scmp.ge.s32.totalorder %s1342_s21, 2  ;;  %s893_s17 = scalar_lea.sflag [#allocation4], %s892_s29 }
 0x5e8   : > { %p1111_p12 = pnand %p1719_p9, %p1718_p7 }
 0x5ea   : > { %1325 = dma.done.wait (!%p1111_p12), %s893_s17, 128  }
 0x5eb   : > { %1327 = vsyncadd (!%p1111_p12), %s893_s17, 4294967168  ;;  %p19_p2 = scmp.ge.s32.totalorder %s1500_s14, 4   ;;  %s1720_s18 = smov %s1334_s19 }
 0x5ec   : > { %s1721_s19 = smov %s1338_s20  ;;  %s1722_s20 = smov %s1516_s27 }
 0x5ed   : > { %s1723_s21 = smov %s1500_s14  ;;  %21 = sbr.rel (!%p19_p2) target bundleno = 6 (0x6), region = 93 }
 0x5f4   :  { %898 = vsyncpa [#allocation3], 1 }
 0x5f5   :  { %900 = vsyncpa [#allocation3 + $0x1], 1 }
 0x5f6   :  { %901 = vsyncpa [#allocation6], 1 }
 0x5f7   :  { %902 = vsyncpa [#allocation4], 1 }
 0x5f8   :  { %904 = vsyncpa [#allocation4 + $0x1], 1 }

</bundles_post_ra>
